<compile_context>
chip_gen: v7x
topology: tpu7x:2x2x1
jax: 0.10.0
libtpu: 0.0.40
codegen_flags: <defaults>
</compile_context>

<pallas_src>
import functools

import numpy as np

import jax
import jax.numpy as jnp
from jax.experimental import pallas as pl
from jax.experimental.pallas import tpu as pltpu


def _round_up(n, m):
    return (n + m - 1) // m * m


def _choose_batch_tiling(B, tile_b, lane=128):
    """Pick (B_pad, tb) with tb % 128 == 0 (batch lives on the lane axis), B_pad % tb == 0.

    Preferences (per perf review): fat tiles (amortize ~0.35us/grid-step overhead),
    >= 2 grid steps when the batch allows it (v7x has 2 TensorCores), and bounded
    padding waste (don't blindly round B up to tile_b).
    """
    tile_b = max(lane, _round_up(tile_b, lane))
    B_lane = _round_up(max(B, 1), lane)
    if B_lane < 2 * lane:
        return B_lane, B_lane                      # single 128-row tile

    # Cap the tile so there are at least two grid steps (megacore sharding).
    cap = min(tile_b, max(lane, (B_lane // 2) // lane * lane))

    # Largest lane-multiple tile <= cap that divides the lane-padded batch.
    best = lane
    for cand in range(lane, cap + 1, lane):
        if B_lane % cand == 0:
            best = cand

    # Compare "no extra padding, maybe more grid steps" against "pad to fat tiles";
    # each grid step is charged as ~64 rows worth of overhead.
    def cost(bpad, tb):
        return bpad + (bpad // tb) * 64

    cand_a = (B_lane, best)
    cand_b = (_round_up(B, cap), cap)
    return min(cand_a, cand_b, key=lambda c: cost(*c))


# ----------------------------- Pallas kernel --------------------------------
def _gfrl_dfm_kernel(lin_ref, emb_ref, wvg_ref, bvg_ref, w1_ref, b1_ref,
                     w2_ref, b2_ref, w3_ref, out_ref, *, num_fields, embed_dim):
    """Fused GFRL gate + FM + MLP kernel for one batch tile (batch on the lane axis).

    lin_ref : (1, TB)    f32   pre-summed first-order term + (linear bias + b3)
    emb_ref : (D, TB)    bf16  gathered embeddings (field-major rows), transposed
    wvg_ref : (2D, D)    bf16  [Wv^T ; Wg^T]
    bvg_ref : (2D, 1)    f32   [bv ; bg]
    w1_ref  : (H1, D)    bf16  W1^T * bn_scale
    b1_ref  : (H1, 1)    f32
    w2_ref  : (H2, H1)   bf16  W2^T * bn_scale
    b2_ref  : (H2, 1)    f32
    w3_ref  : (H2, 1)    f32   final layer applied as an f32 sublane reduce
    out_ref : (1, TB)    f32   lane-dense output row
    """
    D = emb_ref.shape[0]                  # F * E
    E = embed_dim

    flat = emb_ref[...]                                                  # (D, TB) bf16

    # --- GFRL (GLU gate): one fused (2D, D) x (D, TB) matmul; split is a
    # sublane-aligned (D % 8 == 0) free view. -----------------------------------
    hg = jnp.dot(wvg_ref[...], flat,
                 preferred_element_type=jnp.float32) + bvg_ref[...]      # (2D, TB)
    refined = hg[:D, :] * jax.nn.sigmoid(hg[D:, :])                      # (D, TB) f32

    # --- FM second-order term, all f32 -----------------------------------------
    # field_sum[e, b] = sum_f refined[f*E + e, b]; E-row slices are sublane groups.
    field_sum = refined[0:E, :]
    for f in range(1, num_fields):
        field_sum = field_sum + refined[f * E:(f + 1) * E, :]            # (E, TB)
    fm = 0.5 * (jnp.sum(field_sum * field_sum, axis=0, keepdims=True)
                - jnp.sum(refined * refined, axis=0, keepdims=True))     # (1, TB)

    # --- MLP (BatchNorm folded, eval mode) --------------------------------------
    r_bf = refined.astype(jnp.bfloat16)
    z1 = jnp.maximum(jnp.dot(w1_ref[...], r_bf,
                             preferred_element_type=jnp.float32) + b1_ref[...], 0.0)
    z2 = jnp.maximum(jnp.dot(w2_ref[...], z1.astype(jnp.bfloat16),
                             preferred_element_type=jnp.float32) + b2_ref[...], 0.0)
    mlp_out = jnp.sum(z2 * w3_ref[...], axis=0, keepdims=True)           # (1, TB) f32

    # --- First-order term (pre-summed, includes linear bias + b3) ---------------
    out_ref[...] = lin_ref[...] + fm + mlp_out


# ------------------------------- wrapper -------------------------------------
def gfrl_dfm_forward(x, params, field_dims, embed_dim, tile_b=1024):
    """Glue: embedding gathers, BN folding, weight packing in JAX; hot path in Pallas."""
    F = len(field_dims)
    E = embed_dim
    D = F * E
    B = x.shape[0]
    H1, H2 = params["w2"].shape

    B_pad, tb = _choose_batch_tiling(B, tile_b)
    num_tiles = B_pad // tb

    offsets = jnp.asarray(
        np.concatenate([[0], np.cumsum(field_dims)[:-1]]), dtype=jnp.int32)
    idx = x.astype(jnp.int32) + offsets[None, :]                         # (B, F)
    if B_pad != B:
        idx = jnp.pad(idx, ((0, B_pad - B), (0, 0)))                     # pad with idx 0

    # TODO(synk): fuse these gathers into the kernel (scalar-prefetched idx + manual
    # DMA from an HBM-resident table) to avoid materializing (D, B_pad) in HBM.
    emb_t = (jnp.take(params["embed_table"], idx, axis=0)
             .reshape(B_pad, D).T.astype(jnp.bfloat16))                  # (D, B_pad)

    # First-order term pre-summed in the wrapper (fuses into the gather), with the
    # two scalar biases folded in -> single lane-dense (1, B_pad) stream.
    lin_row = (jnp.sum(jnp.take(params["lin_table"], idx, axis=0)[..., 0], axis=-1)
               + params["lin_bias"][0, 0] + params["b3"][0, 0]
               ).astype(jnp.float32).reshape(1, B_pad)

    # Fold eval-mode BatchNorm1d (running mean=0, var=1, gamma=1, beta=0, eps=1e-5).
    bn_scale = jnp.float32(1.0 / np.sqrt(1.0 + 1e-5))

    # Fused GLU weights [Wv^T ; Wg^T] -> one (2D, D) bf16 matmul operand.
    wvg_t = jnp.concatenate([params["wv"].T, params["wg"].T], axis=0).astype(jnp.bfloat16)
    bvg_t = jnp.concatenate([params["bv"], params["bg"]], axis=1).reshape(2 * D, 1)

    w1_t = (params["w1"] * bn_scale).T.astype(jnp.bfloat16)              # (H1, D)
    b1_t = (params["b1"] * bn_scale).reshape(H1, 1)
    w2_t = (params["w2"] * bn_scale).T.astype(jnp.bfloat16)              # (H2, H1)
    b2_t = (params["b2"] * bn_scale).reshape(H2, 1)
    w3_c = params["w3"].reshape(H2, 1).astype(jnp.float32)               # (H2, 1)

    batch_map = lambda i: (0, i)
    const_map = lambda i: (0, 0)

    kernel = functools.partial(_gfrl_dfm_kernel, num_fields=F, embed_dim=E)

    grid_spec = pltpu.PrefetchScalarGridSpec(
        num_scalar_prefetch=0,
        grid=(num_tiles,),
        in_specs=[
            pl.BlockSpec((1, tb), batch_map),        # lin_row (lane-dense)
            pl.BlockSpec((D, tb), batch_map),        # emb_t   (lane-dense)
            pl.BlockSpec((2 * D, D), const_map),     # [Wv^T ; Wg^T]
            pl.BlockSpec((2 * D, 1), const_map),     # [bv ; bg]
            pl.BlockSpec((H1, D), const_map),        # W1^T * bn
            pl.BlockSpec((H1, 1), const_map),        # b1 * bn
            pl.BlockSpec((H2, H1), const_map),       # W2^T * bn
            pl.BlockSpec((H2, 1), const_map),        # b2 * bn
            pl.BlockSpec((H2, 1), const_map),        # w3
        ],
        out_specs=pl.BlockSpec((1, tb), batch_map),  # lane-dense output row
    )

    out = pl.pallas_call(
        kernel,
        out_shape=jax.ShapeDtypeStruct((1, B_pad), jnp.float32),
        grid_spec=grid_spec,
        compiler_params=pltpu.CompilerParams(
            dimension_semantics=("parallel",)),
    )(lin_row, emb_t, wvg_t, bvg_t, w1_t, b1_t, w2_t, b2_t, w3_c)

    return out.reshape(B_pad, 1)[:B]


# --------------------------- pure-JAX reference ------------------------------
def gfrl_dfm_reference(x, params, field_dims, embed_dim):
    F = len(field_dims)
    B = x.shape[0]
    offsets = jnp.asarray(
        np.concatenate([[0], np.cumsum(field_dims)[:-1]]), dtype=jnp.int32)
    idx = x + offsets[None, :]
    emb = jnp.take(params["embed_table"], idx, axis=0)                   # (B, F, E)
    flat = emb.reshape(B, F * embed_dim)

    h = flat @ params["wv"] + params["bv"]
    g = jax.nn.sigmoid(flat @ params["wg"] + params["bg"])
    refined = (h * g).reshape(B, F, embed_dim)

    s = jnp.sum(refined, axis=1)
    sq = jnp.sum(refined * refined, axis=1)
    fm = 0.5 * jnp.sum(s * s - sq, axis=1, keepdims=True)

    bn_scale = 1.0 / jnp.sqrt(1.0 + 1e-5)
    z = jnp.maximum((refined.reshape(B, -1) @ params["w1"] + params["b1"]) * bn_scale, 0.0)
    z = jnp.maximum((z @ params["w2"] + params["b2"]) * bn_scale, 0.0)
    mlp_out = z @ params["w3"] + params["b3"]

    lin = jnp.sum(jnp.take(params["lin_table"], idx, axis=0)[..., 0],
                  axis=1, keepdims=True) + params["lin_bias"][0, 0]
    return lin + fm + mlp_out


# --------------------------------- main --------------------------------------
if __name__ == "__main__":
    field_dims = (10, 12, 8, 14)        # 4 fields
    embed_dim = 8
    mlp_layers = (128, 64)
    B = 8
    F = len(field_dims)
    D = F * embed_dim
    total = sum(field_dims)

    key = jax.random.PRNGKey(0)
    keys = jax.random.split(key, 12)

    params = {
        "embed_table": 0.1 * jax.random.normal(keys[0], (total, embed_dim), jnp.float32),
        "lin_table":   0.1 * jax.random.normal(keys[1], (total, 1), jnp.float32),
        "lin_bias":    jnp.zeros((1, 1), jnp.float32),
        # GFRL (GLU) gate params
        "wv": 0.1 * jax.random.normal(keys[2], (D, D), jnp.float32),
        "bv": jnp.zeros((1, D), jnp.float32),
        "wg": 0.1 * jax.random.normal(keys[3], (D, D), jnp.float32),
        "bg": jnp.zeros((1, D), jnp.float32),
        # MLP params: D -> 128 -> 64 -> 1
        "w1": 0.1 * jax.random.normal(keys[4], (D, mlp_layers[0]), jnp.float32),
        "b1": 0.01 * jax.random.normal(keys[5], (1, mlp_layers[0]), jnp.float32),
        "w2": 0.1 * jax.random.normal(keys[6], (mlp_layers[0], mlp_layers[1]), jnp.float32),
        "b2": 0.01 * jax.random.normal(keys[7], (1, mlp_layers[1]), jnp.float32),
        "w3": 0.1 * jax.random.normal(keys[8], (mlp_layers[1], 1), jnp.float32),
        "b3": jnp.zeros((1, 1), jnp.float32),
    }

    # Deterministic integer feature indices, each within its field's cardinality.
    cols = []
    for i, fd in enumerate(field_dims):
        cols.append(jax.random.randint(keys[9 + (i % 3)], (B, 1), 0, fd, dtype=jnp.int32))
    x = jnp.concatenate(cols, axis=1)                                    # (B, F) int32

    out = gfrl_dfm_forward(x, params, field_dims, embed_dim)
    out = jax.block_until_ready(out)

    ref = jax.block_until_ready(gfrl_dfm_reference(x, params, field_dims, embed_dim))
    np.testing.assert_allclose(np.asarray(out), np.asarray(ref), rtol=2e-2, atol=2e-2)
    assert out.shape == (B, 1)

    print("KERNEL_OK")
</pallas_src>

<mosaic_0001>
module attributes {stable_mosaic.version = 11 : i64} {
  func.func @_gfrl_dfm_kernel(%arg0: i32, %arg1: memref<1x128xf32, #tpu.memory_space<vmem>>, %arg2: memref<32x128xbf16, #tpu.memory_space<vmem>>, %arg3: memref<64x32xbf16, #tpu.memory_space<vmem>>, %arg4: memref<64x1xf32, #tpu.memory_space<vmem>>, %arg5: memref<128x32xbf16, #tpu.memory_space<vmem>>, %arg6: memref<128x1xf32, #tpu.memory_space<vmem>>, %arg7: memref<64x128xbf16, #tpu.memory_space<vmem>>, %arg8: memref<64x1xf32, #tpu.memory_space<vmem>>, %arg9: memref<64x1xf32, #tpu.memory_space<vmem>>, %arg10: memref<1x128xf32, #tpu.memory_space<vmem>>) attributes {dimension_semantics = [#tpu.dimension_semantics<parallel>], iteration_bounds = array<i64: 1>, scalar_prefetch = 0 : i64, scratch_operands = 0 : i64, tpu.core_type = #tpu.core_type<tc>, window_params = [{transform_indices = @transform_0, window_bounds = array<i64: 1, 128>}, {transform_indices = @transform_1, window_bounds = array<i64: 32, 128>}, {pipeline_mode = #tpu.pipeline_mode<synchronous>, transform_indices = @transform_2, window_bounds = array<i64: 64, 32>}, {pipeline_mode = #tpu.pipeline_mode<synchronous>, transform_indices = @transform_3, window_bounds = array<i64: 64, 1>}, {pipeline_mode = #tpu.pipeline_mode<synchronous>, transform_indices = @transform_4, window_bounds = array<i64: 128, 32>}, {pipeline_mode = #tpu.pipeline_mode<synchronous>, transform_indices = @transform_5, window_bounds = array<i64: 128, 1>}, {pipeline_mode = #tpu.pipeline_mode<synchronous>, transform_indices = @transform_6, window_bounds = array<i64: 64, 128>}, {pipeline_mode = #tpu.pipeline_mode<synchronous>, transform_indices = @transform_7, window_bounds = array<i64: 64, 1>}, {pipeline_mode = #tpu.pipeline_mode<synchronous>, transform_indices = @transform_8, window_bounds = array<i64: 64, 1>}, {transform_indices = @transform_9, window_bounds = array<i64: 1, 128>}]} {
    %c0 = arith.constant 0 : index
    %c0_0 = arith.constant 0 : index
    %0 = vector.load %arg2[%c0, %c0_0] : memref<32x128xbf16, #tpu.memory_space<vmem>>, vector<32x128xbf16>
    %c0_1 = arith.constant 0 : index
    %c0_2 = arith.constant 0 : index
    %1 = vector.load %arg3[%c0_1, %c0_2] : memref<64x32xbf16, #tpu.memory_space<vmem>>, vector<64x32xbf16>
    %cst = arith.constant dense<0.000000e+00> : vector<64x128xf32>
    %2 = tpu.matmul %1, %0, %cst {dimension_numbers = #tpu.dot_dimension_numbers<[1], [0], [0], [1], [0, 0, 1, 1], [], []>} : vector<64x32xbf16>, vector<32x128xbf16>, vector<64x128xf32> -> vector<64x128xf32>
    %c0_3 = arith.constant 0 : index
    %c0_4 = arith.constant 0 : index
    %3 = vector.load %arg4[%c0_3, %c0_4] : memref<64x1xf32, #tpu.memory_space<vmem>>, vector<64x1xf32>
    %4 = vector.broadcast %3 : vector<64x1xf32> to vector<64x128xf32>
    %5 = arith.addf %2, %4 : vector<64x128xf32>
    %6 = vector.extract_strided_slice %5 {offsets = [0, 0], sizes = [32, 128], strides = [1, 1]} : vector<64x128xf32> to vector<32x128xf32>
    %7 = vector.extract_strided_slice %5 {offsets = [32, 0], sizes = [32, 128], strides = [1, 1]} : vector<64x128xf32> to vector<32x128xf32>
    %8 = arith.negf %7 : vector<32x128xf32>
    %9 = math.exp %8 : vector<32x128xf32>
    %cst_5 = arith.constant 1.000000e+00 : f32
    %10 = vector.broadcast %cst_5 : f32 to vector<32x128xf32>
    %11 = arith.addf %10, %9 : vector<32x128xf32>
    %12 = arith.divf %10, %11 : vector<32x128xf32>
    %13 = arith.mulf %6, %12 : vector<32x128xf32>
    %14 = vector.extract_strided_slice %13 {offsets = [0, 0], sizes = [8, 128], strides = [1, 1]} : vector<32x128xf32> to vector<8x128xf32>
    %15 = vector.extract_strided_slice %13 {offsets = [8, 0], sizes = [8, 128], strides = [1, 1]} : vector<32x128xf32> to vector<8x128xf32>
    %16 = arith.addf %14, %15 : vector<8x128xf32>
    %17 = vector.extract_strided_slice %13 {offsets = [16, 0], sizes = [8, 128], strides = [1, 1]} : vector<32x128xf32> to vector<8x128xf32>
    %18 = arith.addf %16, %17 : vector<8x128xf32>
    %19 = vector.extract_strided_slice %13 {offsets = [24, 0], sizes = [8, 128], strides = [1, 1]} : vector<32x128xf32> to vector<8x128xf32>
    %20 = arith.addf %18, %19 : vector<8x128xf32>
    %21 = arith.mulf %20, %20 : vector<8x128xf32>
    %cst_6 = arith.constant dense<0.000000e+00> : vector<128xf32>
    %22 = vector.multi_reduction <add>, %21, %cst_6 [0] : vector<8x128xf32> to vector<128xf32>
    %23 = vector.shape_cast %22 : vector<128xf32> to vector<1x128xf32>
    %24 = arith.mulf %13, %13 : vector<32x128xf32>
    %cst_7 = arith.constant dense<0.000000e+00> : vector<128xf32>
    %25 = vector.multi_reduction <add>, %24, %cst_7 [0] : vector<32x128xf32> to vector<128xf32>
    %26 = vector.shape_cast %25 : vector<128xf32> to vector<1x128xf32>
    %27 = arith.subf %23, %26 : vector<1x128xf32>
    %cst_8 = arith.constant 5.000000e-01 : f32
    %28 = vector.broadcast %cst_8 : f32 to vector<1x128xf32>
    %29 = arith.mulf %28, %27 : vector<1x128xf32>
    %30 = arith.truncf %13 : vector<32x128xf32> to vector<32x128xbf16>
    %c0_9 = arith.constant 0 : index
    %c0_10 = arith.constant 0 : index
    %31 = vector.load %arg5[%c0_9, %c0_10] : memref<128x32xbf16, #tpu.memory_space<vmem>>, vector<128x32xbf16>
    %cst_11 = arith.constant dense<0.000000e+00> : vector<128x128xf32>
    %32 = tpu.matmul %31, %30, %cst_11 {dimension_numbers = #tpu.dot_dimension_numbers<[1], [0], [0], [1], [0, 0, 1, 1], [], []>} : vector<128x32xbf16>, vector<32x128xbf16>, vector<128x128xf32> -> vector<128x128xf32>
    %c0_12 = arith.constant 0 : index
    %c0_13 = arith.constant 0 : index
    %33 = vector.load %arg6[%c0_12, %c0_13] : memref<128x1xf32, #tpu.memory_space<vmem>>, vector<128x1xf32>
    %34 = vector.broadcast %33 : vector<128x1xf32> to vector<128x128xf32>
    %35 = arith.addf %32, %34 : vector<128x128xf32>
    %cst_14 = arith.constant 0.000000e+00 : f32
    %36 = vector.broadcast %cst_14 : f32 to vector<128x128xf32>
    %37 = arith.maximumf %35, %36 : vector<128x128xf32>
    %c0_15 = arith.constant 0 : index
    %c0_16 = arith.constant 0 : index
    %38 = vector.load %arg7[%c0_15, %c0_16] : memref<64x128xbf16, #tpu.memory_space<vmem>>, vector<64x128xbf16>
    %39 = arith.truncf %37 : vector<128x128xf32> to vector<128x128xbf16>
    %cst_17 = arith.constant dense<0.000000e+00> : vector<64x128xf32>
    %40 = tpu.matmul %38, %39, %cst_17 {dimension_numbers = #tpu.dot_dimension_numbers<[1], [0], [0], [1], [0, 0, 1, 1], [], []>} : vector<64x128xbf16>, vector<128x128xbf16>, vector<64x128xf32> -> vector<64x128xf32>
    %c0_18 = arith.constant 0 : index
    %c0_19 = arith.constant 0 : index
    %41 = vector.load %arg8[%c0_18, %c0_19] : memref<64x1xf32, #tpu.memory_space<vmem>>, vector<64x1xf32>
    %42 = vector.broadcast %41 : vector<64x1xf32> to vector<64x128xf32>
    %43 = arith.addf %40, %42 : vector<64x128xf32>
    %cst_20 = arith.constant 0.000000e+00 : f32
    %44 = vector.broadcast %cst_20 : f32 to vector<64x128xf32>
    %45 = arith.maximumf %43, %44 : vector<64x128xf32>
    %c0_21 = arith.constant 0 : index
    %c0_22 = arith.constant 0 : index
    %46 = vector.load %arg9[%c0_21, %c0_22] : memref<64x1xf32, #tpu.memory_space<vmem>>, vector<64x1xf32>
    %47 = vector.broadcast %46 : vector<64x1xf32> to vector<64x128xf32>
    %48 = arith.mulf %45, %47 : vector<64x128xf32>
    %cst_23 = arith.constant dense<0.000000e+00> : vector<128xf32>
    %49 = vector.multi_reduction <add>, %48, %cst_23 [0] : vector<64x128xf32> to vector<128xf32>
    %50 = vector.shape_cast %49 : vector<128xf32> to vector<1x128xf32>
    %c0_24 = arith.constant 0 : index
    %c0_25 = arith.constant 0 : index
    %51 = vector.load %arg1[%c0_24, %c0_25] : memref<1x128xf32, #tpu.memory_space<vmem>>, vector<1x128xf32>
    %52 = arith.addf %51, %29 : vector<1x128xf32>
    %53 = arith.addf %52, %50 : vector<1x128xf32>
    %c0_26 = arith.constant 0 : index
    %c0_27 = arith.constant 0 : index
    %54 = vector.load %arg10[%c0_26, %c0_27] : memref<1x128xf32, #tpu.memory_space<vmem>>, vector<1x128xf32>
    tpu.vector_store %arg10[%c0_26, %c0_27], %53 {strides = array<i32>} : memref<1x128xf32, #tpu.memory_space<vmem>>, vector<1x128xf32>,
    return
  }
  func.func @transform_0(%arg0: i32) -> (i32, i32) {
    %c0_i32 = arith.constant 0 : i32
    %c0_i32_0 = arith.constant 0 : i32
    return %c0_i32, %arg0 : i32, i32
  }
  func.func @transform_1(%arg0: i32) -> (i32, i32) {
    %c0_i32 = arith.constant 0 : i32
    %c0_i32_0 = arith.constant 0 : i32
    return %c0_i32, %arg0 : i32, i32
  }
  func.func @transform_2(%arg0: i32) -> (i32, i32) {
    %c0_i32 = arith.constant 0 : i32
    %c0_i32_0 = arith.constant 0 : i32
    %c0_i32_1 = arith.constant 0 : i32
    return %c0_i32, %c0_i32_0 : i32, i32
  }
  func.func @transform_3(%arg0: i32) -> (i32, i32) {
    %c0_i32 = arith.constant 0 : i32
    %c0_i32_0 = arith.constant 0 : i32
    %c0_i32_1 = arith.constant 0 : i32
    return %c0_i32, %c0_i32_0 : i32, i32
  }
  func.func @transform_4(%arg0: i32) -> (i32, i32) {
    %c0_i32 = arith.constant 0 : i32
    %c0_i32_0 = arith.constant 0 : i32
    %c0_i32_1 = arith.constant 0 : i32
    return %c0_i32, %c0_i32_0 : i32, i32
  }
  func.func @transform_5(%arg0: i32) -> (i32, i32) {
    %c0_i32 = arith.constant 0 : i32
    %c0_i32_0 = arith.constant 0 : i32
    %c0_i32_1 = arith.constant 0 : i32
    return %c0_i32, %c0_i32_0 : i32, i32
  }
  func.func @transform_6(%arg0: i32) -> (i32, i32) {
    %c0_i32 = arith.constant 0 : i32
    %c0_i32_0 = arith.constant 0 : i32
    %c0_i32_1 = arith.constant 0 : i32
    return %c0_i32, %c0_i32_0 : i32, i32
  }
  func.func @transform_7(%arg0: i32) -> (i32, i32) {
    %c0_i32 = arith.constant 0 : i32
    %c0_i32_0 = arith.constant 0 : i32
    %c0_i32_1 = arith.constant 0 : i32
    return %c0_i32, %c0_i32_0 : i32, i32
  }
  func.func @transform_8(%arg0: i32) -> (i32, i32) {
    %c0_i32 = arith.constant 0 : i32
    %c0_i32_0 = arith.constant 0 : i32
    %c0_i32_1 = arith.constant 0 : i32
    return %c0_i32, %c0_i32_0 : i32, i32
  }
  func.func @transform_9(%arg0: i32) -> (i32, i32) {
    %c0_i32 = arith.constant 0 : i32
    %c0_i32_0 = arith.constant 0 : i32
    return %c0_i32, %arg0 : i32, i32
  }
}

</mosaic_0001>

<bundles_post_ra>
// kernel: tpu_custom_call.1
= control target key start
LH: loop header
LB: loop body
LE: loop exit
PB: predicated region body
PF: predicated region fallthrough
CT: control target
= control target key end

     0   :  { %vm126_vm0 = vcmask 261120   ;;  %v992_v3 = vmov 0   ;;  %s1254_s0 = inlined_call_operand.vmem [shape: f32[1,128], index: 0, kind: input, shape index: {}]   ;;  %s1255_s1 = inlined_call_operand.vmem [shape: bf16[32,128], index: 1, kind: input, shape index: {}]   ;;  %s1256_s2 = inlined_call_operand.vmem [shape: bf16[64,32], index: 2, kind: input, shape index: {}]   ;;  %s1257_s3 = inlined_call_operand.vmem [shape: f32[64,1], index: 3, kind: input, shape index: {}]   ;;  %s1258_s4 = inlined_call_operand.vmem [shape: bf16[128,32], index: 4, kind: input, shape index: {}]   ;;  %s1259_s5 = inlined_call_operand.vmem [shape: f32[128,1], index: 5, kind: input, shape index: {}]   ;;  %s1260_s6 = inlined_call_operand.vmem [shape: bf16[64,128], index: 6, kind: input, shape index: {}]   ;;  %s1261_s7 = inlined_call_operand.vmem [shape: f32[64,1], index: 7, kind: input, shape index: {}]   ;;  %s1262_s8 = inlined_call_operand.vmem [shape: f32[64,1], index: 8, kind: input, shape index: {}]   ;;  %s1263_s9 = inlined_call_operand.hbm [shape: f32[1,128], index: 9, kind: output, shape index: {}]  }
   0x1   :  { %v934_v0 = vld [vmem:[%s1255_s1] sm:$0xff]   ;;  %v935_v1 = vld [vmem:[%s1255_s1 + $0x8] sm:$0xff]   ;;  %932 = vset.pattern.permute.xlu0 %v992_v3  ;;  %933 = vset.pattern.permute.xlu1 %v992_v3  ;;  %v52_v6 = vld [vmem:[%s1257_s3 + $0x30] sm:$0xff] }
   0x2   :  { %858 = vmatprep.subr.bf16.mxu0 %v934_v0  ;;  %v936_v2 = vld [vmem:[%s1256_s2] sm:$0xff]   ;;  %v937_v4 = vld [vmem:[%s1256_s2 + $0x8] sm:$0xff]   ;;  %v938_v7 = vld [vmem:[%s1256_s2 + $0x10] sm:$0xff]   ;;  %86 = vperm.xlu1 %933, %v52_v6  }
   0x3   :  { %859 = vmatpush3.bf16.msra.mxu0 %v934_v0  ;;  %862 = vmatprep.mubr.msk.bf16.mxu0 %vm126_vm0, %v936_v2  ;;  %v50_v5 = vld [vmem:[%s1257_s3 + $0x20] sm:$0xff]  ;;  %v51_v8 = vld [vmem:[%s1257_s3 + $0x28] sm:$0xff]  ;;  %v53_v9 = vld [vmem:[%s1257_s3 + $0x38] sm:$0xff] }
   0x4   :  { %860 = vmatprep.subr.bf16.mxu0 %v935_v1  ;;  %76 = vperm.xlu0 %932, %v50_v5   ;;  %v46_v10 = vld [vmem:[%s1257_s3] sm:$0xff]  ;;  %v47_v11 = vld [vmem:[%s1257_s3 + $0x8] sm:$0xff]  ;;  %v939_v12 = vld [vmem:[%s1256_s2 + $0x18] sm:$0xff]  }
   0x5   :  { %v48_v13 = vld [vmem:[%s1257_s3 + $0x10] sm:$0xff]  ;;  %v49_v14 = vld [vmem:[%s1257_s3 + $0x18] sm:$0xff]  ;;  %v275_v15 = vld [vmem:[%s1259_s5] sm:$0xff] }
   0x6   :  { %91 = vperm.xlu1 %933, %v53_v9   ;;  %v276_v16 = vld [vmem:[%s1259_s5 + $0x8] sm:$0xff]  ;;  %v277_v17 = vld [vmem:[%s1259_s5 + $0x10] sm:$0xff]  ;;  %v278_v18 = vld [vmem:[%s1259_s5 + $0x18] sm:$0xff] }
   0x7   :  { %861 = vmatpush3.bf16.msra.mxu0 %v935_v1 }
   0x8   :  { %81 = vperm.xlu0 %932, %v51_v8  }
   0xa   :  { %863 = vmatmul.mubr.msk.bf16.vlgmr.msra.gmra.mrb[0].mxu0 %vm126_vm0, %v937_v4  ;;  %61 = vperm.xlu1 %933, %v47_v11  }
   0xb   :  { %866 = vmatprep.mubr.msk.bf16.mxu0 %vm126_vm0, %v938_v7 }
   0xc   :  { %56 = vperm.xlu0 %932, %v46_v10  }
   0xe   :  { %71 = vperm.xlu1 %933, %v49_v14  }
  0x10   :  { %66 = vperm.xlu0 %932, %v48_v13  }
  0x12   :  { %867 = vmatmul.mubr.msk.bf16.gmra.mrb[4].mxu0 %vm126_vm0, %v939_v12  ;;  %298 = vperm.xlu1 %933, %v276_v16  }
  0x14   :  { %293 = vperm.xlu0 %932, %v275_v15  }
  0x18   :  { %303 = vperm.xlu0 %932, %v277_v17  }
  0x19   :  { %14 = vsyncpa [#allocation3], 0  ;;  %308 = vperm.xlu1 %933, %v278_v18   ;;  %v279_v19 = vld [vmem:[%s1259_s5 + $0x20] sm:$0xff]  ;;  %v280_v20 = vld [vmem:[%s1259_s5 + $0x28] sm:$0xff]  ;;  %s993_s24 = smov [#allocation2]  }
  0x1a   :  { %v281_v21 = vld [vmem:[%s1259_s5 + $0x30] sm:$0xff]  ;;  %v282_v22 = vld [vmem:[%s1259_s5 + $0x38] sm:$0xff]  ;;  %v283_v23 = vld [vmem:[%s1259_s5 + $0x40] sm:$0xff]  ;;  %s788_s25 = sshll.u32 %s993_s24, 4  ;;  %s789_s25 = int_to_ptr.vmem [resolvable:$true] %s788_s25 }
  0x1b   :  { %v284_v24 = vld [vmem:[%s1259_s5 + $0x48] sm:$0xff]  ;;  %v285_v25 = vld [vmem:[%s1259_s5 + $0x50] sm:$0xff]  ;;  %v286_v26 = vld [vmem:[%s1259_s5 + $0x58] sm:$0xff]  ;;  %s968_s26 = scalar_lea.vmem %s789_s25, 16  ;;  %s972_s27 = scalar_lea.vmem %s789_s25, 32 }
  0x1c   :  { %313 = vperm.xlu0 %932, %v279_v19   ;;  %v287_v27 = vld [vmem:[%s1259_s5 + $0x60] sm:$0xff]  ;;  %v288_v28 = vld [vmem:[%s1259_s5 + $0x68] sm:$0xff]  ;;  %v289_v29 = vld [vmem:[%s1259_s5 + $0x70] sm:$0xff]  ;;  %p969_p0 = scmp.ne.s32.totalorder %s789_s25, %s968_s26  ;;  %p973_p1 = scmp.lt.s32.totalorder %s789_s25, %s789_s25 }
  0x1d   :  { %318 = vperm.xlu1 %933, %v280_v20   ;;  %v290_v30 = vld [vmem:[%s1259_s5 + $0x78] sm:$0xff]  ;;  %v564_v31 = vld [vmem:[%s1261_s7] sm:$0xff]  ;;  %v565_v32 = vld [vmem:[%s1261_s7 + $0x8] sm:$0xff]  ;;  %p974_p2 = scmp.lt.s32.totalorder %s972_s27, %s968_s26 }
  0x1e   :  { %v566_v33 = vld [vmem:[%s1261_s7 + $0x10] sm:$0xff]  ;;  %v567_v34 = vld [vmem:[%s1261_s7 + $0x18] sm:$0xff]  ;;  %v709_v35 = vld [vmem:[%s1262_s8] sm:$0xff] }
  0x1f   :  { %v710_v36 = vld [vmem:[%s1262_s8 + $0x8] sm:$0xff]  ;;  %v568_v37 = vld [vmem:[%s1261_s7 + $0x20] sm:$0xff]  ;;  %v711_v38 = vld [vmem:[%s1262_s8 + $0x10] sm:$0xff]  ;;  %p975_p3 = por %p974_p2, %p973_p1 }
  0x20   :  { %323 = vperm.xlu0 %932, %v281_v21   ;;  %v569_v39 = vld [vmem:[%s1261_s7 + $0x28] sm:$0xff]  ;;  %v712_v40 = vld [vmem:[%s1262_s8 + $0x18] sm:$0xff]  ;;  %v570_v41 = vld [vmem:[%s1261_s7 + $0x30] sm:$0xff] }
  0x21   :  { %328 = vperm.xlu1 %933, %v282_v22   ;;  %v713_v42 = vld [vmem:[%s1262_s8 + $0x20] sm:$0xff]  ;;  %v571_v43 = vld [vmem:[%s1261_s7 + $0x38] sm:$0xff]  ;;  %v714_v44 = vld [vmem:[%s1262_s8 + $0x28] sm:$0xff]  ;;  %p976_p4 = pnand %p975_p3, %p969_p0 }
  0x22   :  { %v715_v45 = vld [vmem:[%s1262_s8 + $0x30] sm:$0xff]  ;;  %v716_v46 = vld [vmem:[%s1262_s8 + $0x38] sm:$0xff]  ;;  %v940_v47 = vld [vmem:[%s1258_s4] sm:$0xff]  }
  0x23   :  { %874 = vmatprep.mubr.msk.bf16.mxu1 %vm126_vm0, %v940_v47 }
  0x24   :  { %333 = vperm.xlu0 %932, %v283_v23  }
  0x25   :  { %338 = vperm.xlu1 %933, %v284_v24  }
  0x28   :  { %343 = vperm.xlu0 %932, %v285_v25  }
  0x29   :  { %348 = vperm.xlu1 %933, %v286_v26  }
  0x2c   :  { %353 = vperm.xlu0 %932, %v287_v27  }
  0x2d   :  { %358 = vperm.xlu1 %933, %v288_v28  }
  0x30   :  { %363 = vperm.xlu0 %932, %v289_v29  }
  0x31   :  { %368 = vperm.xlu1 %933, %v290_v30  }
  0x34   :  { %574 = vperm.xlu0 %932, %v564_v31  }
  0x35   :  { %579 = vperm.xlu1 %933, %v565_v32  }
  0x38   :  { %584 = vperm.xlu0 %932, %v566_v33  }
  0x39   :  { %589 = vperm.xlu1 %933, %v567_v34  }
  0x3c   :  { %719 = vperm.xlu0 %932, %v709_v35  }
  0x3d   :  { %724 = vperm.xlu1 %933, %v710_v36  }
  0x40   :  { %594 = vperm.xlu0 %932, %v568_v37  }
  0x41   :  { %729 = vperm.xlu1 %933, %v711_v38  }
  0x44   :  { %599 = vperm.xlu0 %932, %v569_v39  }
  0x45   :  { %734 = vperm.xlu1 %933, %v712_v40   ;;  %v941_v40 = vld [vmem:[%s1258_s4 + $0x8] sm:$0xff]  }
  0x48   :  { %604 = vperm.xlu0 %932, %v570_v41  }
  0x49   :  { %739 = vperm.xlu1 %933, %v713_v42   ;;  %v942_v42 = vld [vmem:[%s1258_s4 + $0x10] sm:$0xff]  }
  0x4c   :  { %609 = vperm.xlu0 %932, %v571_v43  }
  0x4d   :  { %744 = vperm.xlu1 %933, %v714_v44  }
  0x50   :  { %749 = vperm.xlu0 %932, %v715_v45  }
  0x51   :  { %754 = vperm.xlu1 %933, %v716_v46  }
  0x81   :  { %v87_v52 = vpop.permute.xlu1 %86 }
  0x83   :  { %v77_v53 = vpop.permute.xlu0 %76 }
  0x85   :  { %v92_v57 = vpop.permute.xlu1 %91 }
  0x87   :  { %v82_v60 = vpop.permute.xlu0 %81 }
  0x89   :  { %v62_v13 = vpop.permute.xlu1 %61 }
  0x8b   :  { %v57_v12 = vpop.permute.xlu0 %56 }
  0x8d   :  { %v72_v17 = vpop.permute.xlu1 %71 }
  0x8f   :  { %v67_v14 = vpop.permute.xlu0 %66 }
  0xdd   :  { %v864_v48 = vpop.f32.mrb[0].mxu0 }
  0xde   :  { %v173_v49 = vpop.f32.mrb[1].mxu0  ;;  %v182_v15 = vadd.f32 %v864_v48, %v67_v14 }
  0xdf   :  { %v865_v50 = vpop.f32.mrb[2].mxu0  ;;  %v174_v18 = vadd.f32 %v173_v49, %v57_v12  ;;  %v943_v49 = vld [vmem:[%s1258_s4 + $0x18] sm:$0xff]  }
  0xe0   :  { %v176_v51 = vpop.f32.mrb[3].mxu0  ;;  %v185_v20 = vadd.f32 %v865_v50, %v72_v17 }
  0xe1   :  { %v177_v23 = vadd.f32 %v176_v51, %v62_v13 }
  0xe5   :  { %v868_v54 = vpop.f32.mrb[4].mxu0 }
  0xe6   :  { %v198_v55 = vadd.f32 %v868_v54, %v87_v52  ;;  %v189_v56 = vpop.f32.mrb[5].mxu0  ;;  %v944_v52 = vld [vmem:[%s1258_s4 + $0x20] sm:$0xff]  }
  0xe7   :  { %v190_v58 = vadd.f32 %v189_v56, %v77_v53  ;;  %v869_v59 = vpop.f32.mrb[6].mxu0 }
  0xe8   :  { %v808_v61 = vmul.f32 -1.442695, %v198_v55  ;;  %v201_v62 = vadd.f32 %v869_v59, %v92_v57  ;;  %v192_v63 = vpop.f32.mrb[7].mxu0  ;;  %v946_v59 = vld [vmem:[%s1258_s4 + $0x30] sm:$0xff]  }
  0xe9   :  { %v806_v0 = vmul.f32 -1.442695, %v190_v58  ;;  %v193_v1 = vadd.f32 %v192_v63, %v82_v60  ;;  %v945_v58 = vld [vmem:[%s1258_s4 + $0x28] sm:$0xff]   ;;  %v947_v60 = vld [vmem:[%s1258_s4 + $0x38] sm:$0xff]   ;;  %v294_v63 = vpop.permute.xlu0 %293 }
  0xea   :  { %952 = vpow2.f32 %v808_v61  ;;  %v809_v2 = vmul.f32 -1.442695, %v201_v62  ;;  %v948_v61 = vld [vmem:[%s1260_s6] sm:$0xff]   ;;  %v949_v62 = vld [vmem:[%s1260_s6 + $0x10] sm:$0xff]  }
  0xeb   :  { %954 = vpow2.f32 %v806_v0  ;;  %v807_v3 = vmul.f32 -1.442695, %v193_v1  ;;  %906 = vmatprep.mubr.bf16.mxu0 %v948_v61  ;;  %v299_v0 = vpop.permute.xlu1 %298 }
  0xec   :  { %956 = vpow2.f32 %v809_v2 }
  0xed   :  { %958 = vpow2.f32 %v807_v3  ;;  %v304_v1 = vpop.permute.xlu0 %303 }
  0xef   :  { %v309_v2 = vpop.permute.xlu1 %308 }
  0xf1   :  { %v314_v3 = vpop.permute.xlu0 %313 }
  0xf4   :  { %v953_v4 = vpop.eup %952 }
  0xf5   :  { %v955_v5 = vpop.eup %954  ;;  %v218_v6 = vadd.f32 1.0, %v953_v4  ;;  %v319_v4 = vpop.permute.xlu1 %318 }
  0xf6   :  { %v957_v7 = vpop.eup %956  ;;  %v216_v8 = vadd.f32 1.0, %v955_v5  ;;  %v324_v5 = vpop.permute.xlu0 %323 }
  0xf7   :  { %v959_v9 = vpop.eup %958  ;;  %960 = vrcp.f32 %v218_v6  ;;  %v219_v10 = vadd.f32 1.0, %v957_v7 }
  0xf8   :  { %962 = vrcp.f32 %v216_v8  ;;  %v217_v11 = vadd.f32 1.0, %v959_v9 }
  0xf9   :  { %964 = vrcp.f32 %v219_v10  ;;  %v329_v9 = vpop.permute.xlu1 %328 }
  0xfa   :  { %966 = vrcp.f32 %v217_v11  ;;  %v334_v17 = vpop.permute.xlu0 %333 }
 0x101   :  { %v961_v16 = vpop.eup %960 }
 0x102   :  { %v963_v19 = vpop.eup %962  ;;  %v230_v21 = vmul.f32 %v961_v16, %v182_v15 }
 0x103   :  { %v965_v22 = vpop.eup %964  ;;  %v228_v24 = vmul.f32 %v963_v19, %v174_v18 }
 0x104   :  { %v967_v25 = vpop.eup %966  ;;  %v231_v26 = vmul.f32 %v965_v22, %v185_v20  ;;  %v244_v35 = vmul.f32 %v230_v21, %v230_v21 }
 0x105   :  { %v229_v27 = vmul.f32 %v967_v25, %v177_v23  ;;  %v242_v30 = vmul.f32 %v228_v24, %v228_v24 }
 0x106   :  { %v258_v28 = vpack.c.bf16 %v231_v26, %v230_v21  ;;  %v245_v37 = vmul.f32 %v231_v26, %v231_v26 }
 0x107   :  { %v232_v29 = vadd.f32 %v229_v27, %v228_v24  ;;  %v243_v31 = vmul.f32 %v229_v27, %v229_v27  ;;  %v257_v32 = vpack.c.bf16 %v229_v27, %v228_v24 }
 0x109   :  { %v246_v33 = vadd.f32 %v243_v31, %v242_v30  ;;  %870 = vmatprep.subr.bf16.mxu1 %v257_v32  ;;  %v233_v34 = vadd.f32 %v232_v29, %v230_v21  ;;  %v339_v21 = vpop.permute.xlu1 %338  ;;  %v344_v30 = vpop.permute.xlu0 %343 }
 0x10a   :  { %871 = vmatpush3.bf16.msra.mxu1 %v257_v32 }
 0x10b   :  { %v234_v36 = vadd.f32 %v233_v34, %v231_v26  ;;  %v247_v38 = vadd.f32 %v246_v33, %v244_v35  ;;  %872 = vmatprep.subr.bf16.mxu1 %v258_v28 }
 0x10d   :  { %v235_v39 = vmul.f32 %v234_v36, %v234_v36  ;;  %v248_v41 = vadd.f32 %v247_v38, %v245_v37  ;;  %v349_v34 = vpop.permute.xlu1 %348 }
 0x10e   :  { %873 = vmatpush3.bf16.msra.mxu1 %v258_v28 }
 0x10f   :  { %v236_v43 = vrot.slane %v235_v39, 4  ;;  %v249_v44 = vrot.slane %v248_v41, 4 }
 0x111   :  { %875 = vmatmul.mubr.msk.bf16.vlgmr.msra.gmra.mrb[0].mxu1 %vm126_vm0, %v941_v40  ;;  %v237_v45 = vadd.f32 %v236_v43, %v235_v39  ;;  %v250_v46 = vadd.f32 %v249_v44, %v248_v41 }
 0x112   :  { %878 = vmatprep.mubr.msk.bf16.mxu1 %vm126_vm0, %v942_v42  ;;  %v354_v42 = vpop.permute.xlu0 %353 }
 0x113   :  { %v238_v47 = vrot.slane %v237_v45, 2  ;;  %v251_v48 = vrot.slane %v250_v46, 2 }
 0x115   :  { %v239_v50 = vadd.f32 %v238_v47, %v237_v45  ;;  %v252_v51 = vadd.f32 %v251_v48, %v250_v46  ;;  %v359_v47 = vpop.permute.xlu1 %358 }
 0x117   :  { %v240_v53 = vrot.slane %v239_v50, 1  ;;  %v253_v54 = vrot.slane %v252_v51, 1 }
 0x119   :  { %879 = vmatmul.mubr.msk.bf16.gmra.mrb[4].mxu1 %vm126_vm0, %v943_v49  ;;  %v1205_v55 = vadd.f32 %v240_v53, %v239_v50  ;;  %v1207_v56 = vadd.f32 %v253_v54, %v252_v51  ;;  %v364_v54 = vpop.permute.xlu0 %363 }
 0x11a   :  { %882 = vmatprep.mubr.msk.bf16.mxu1 %vm126_vm0, %v944_v52 }
 0x11b   :  { %v255_v57 = vsub.f32 %v1205_v55, %v1207_v56 }
 0x121   :  { %883 = vmatmul.mubr.msk.bf16.gmra.mrb[8].mxu1 %vm126_vm0, %v945_v58 }
 0x122   :  { %886 = vmatprep.mubr.msk.bf16.mxu1 %vm126_vm0, %v946_v59 }
 0x129   :  { %887 = vmatmul.mubr.msk.bf16.gmra.mrb[12].mxu1 %vm126_vm0, %v947_v60 }
 0x12a   :  { %910 = vmatprep.mubr.bf16.mxu1 %v949_v62  ;;  %v369_v62 = vpop.permute.xlu1 %368 }
 0x1e4   :  { %v876_v6 = vpop.f32.mrb[0].mxu1 }
 0x1e5   :  { %v478_v7 = vadd.f32 %v876_v6, %v304_v1  ;;  %v469_v8 = vpop.f32.mrb[1].mxu1 }
 0x1e6   :  { %v470_v10 = vadd.f32 %v469_v8, %v294_v63  ;;  %v877_v11 = vpop.f32.mrb[2].mxu1 }
 0x1e7   :  { %v481_v12 = vadd.f32 %v877_v11, %v309_v2  ;;  %v472_v13 = vpop.f32.mrb[3].mxu1  ;;  %v534_v15 = vmax.f32 %v478_v7, 0.0  ;;  %v951_v11 = vld [vmem:[%s1260_s6 + $0x18] sm:$0xff]  }
 0x1e8   :  { %v473_v14 = vadd.f32 %v472_v13, %v299_v0  ;;  %v532_v18 = vmax.f32 %v470_v10, 0.0  ;;  %v950_v10 = vld [vmem:[%s1260_s6 + $0x8] sm:$0xff]   ;;  %v580_v13 = vpop.permute.xlu1 %579 }
 0x1e9   :  { %v535_v16 = vmax.f32 %v481_v12, 0.0  ;;  %v575_v12 = vpop.permute.xlu0 %574 }
 0x1ea   :  { %v533_v19 = vmax.f32 %v473_v14, 0.0 }
 0x1eb   :  { %v557_v20 = vpack.c.bf16 %v535_v16, %v534_v15 }
 0x1ec   :  { %v556_v22 = vpack.c.bf16 %v533_v19, %v532_v18  ;;  %v880_v23 = vpop.f32.mrb[4].mxu1  ;;  %v590_v15 = vpop.permute.xlu1 %589 }
 0x1ed   :  { %v494_v24 = vadd.f32 %v880_v23, %v324_v5  ;;  %v485_v25 = vpop.f32.mrb[5].mxu1  ;;  %v585_v14 = vpop.permute.xlu0 %584 }
 0x1ee   :  { %v486_v26 = vadd.f32 %v485_v25, %v314_v3  ;;  %v881_v27 = vpop.f32.mrb[6].mxu1  ;;  %890 = vmatprep.subr.bf16.mxu0 %v556_v22  ;;  %914 = vmatprep.subr.bf16.mxu1 %v556_v22 }
 0x1ef   :  { %v497_v28 = vadd.f32 %v881_v27, %v329_v9  ;;  %v488_v29 = vpop.f32.mrb[7].mxu1  ;;  %891 = vmatpush3.bf16.msra.mxu0 %v556_v22  ;;  %922 = vmatpush3.bf16.msra.mxu1 %v556_v22  ;;  %v538_v32 = vmax.f32 %v494_v24, 0.0 }
 0x1f0   :  { %v489_v31 = vadd.f32 %v488_v29, %v319_v4  ;;  %892 = vmatprep.subr.bf16.mxu0 %v557_v20  ;;  %915 = vmatprep.subr.bf16.mxu1 %v557_v20  ;;  %v536_v35 = vmax.f32 %v486_v26, 0.0 }
 0x1f1   :  { %v539_v33 = vmax.f32 %v497_v28, 0.0  ;;  %v720_v16 = vpop.permute.xlu0 %719 }
 0x1f2   :  { %v537_v36 = vmax.f32 %v489_v31, 0.0 }
 0x1f3   :  { %v559_v37 = vpack.c.bf16 %v539_v33, %v538_v32  ;;  %893 = vmatpush3.bf16.msra.mxu0 %v557_v20  ;;  %923 = vmatpush3.bf16.msra.mxu1 %v557_v20 }
 0x1f4   :  { %v558_v38 = vpack.c.bf16 %v537_v36, %v536_v35  ;;  %v884_v39 = vpop.f32.mrb[8].mxu1 }
 0x1f5   :  { %v510_v40 = vadd.f32 %v884_v39, %v344_v30  ;;  %v501_v41 = vpop.f32.mrb[9].mxu1  ;;  %v595_v18 = vpop.permute.xlu0 %594 }
 0x1f6   :  { %v502_v43 = vadd.f32 %v501_v41, %v334_v17  ;;  %v885_v44 = vpop.f32.mrb[10].mxu1  ;;  %894 = vmatprep.subr.bf16.mxu0 %v558_v38  ;;  %916 = vmatprep.subr.bf16.mxu1 %v558_v38  ;;  %v725_v17 = vpop.permute.xlu1 %724 }
 0x1f7   :  { %v513_v45 = vadd.f32 %v885_v44, %v349_v34  ;;  %v504_v46 = vpop.f32.mrb[11].mxu1  ;;  %895 = vmatpush3.bf16.msra.mxu0 %v558_v38  ;;  %924 = vmatpush3.bf16.msra.mxu1 %v558_v38  ;;  %v542_v49 = vmax.f32 %v510_v40, 0.0 }
 0x1f8   :  { %v505_v48 = vadd.f32 %v504_v46, %v339_v21  ;;  %896 = vmatprep.subr.bf16.mxu0 %v559_v37  ;;  %917 = vmatprep.subr.bf16.mxu1 %v559_v37  ;;  %v540_v51 = vmax.f32 %v502_v43, 0.0 }
 0x1f9   :  { %v543_v50 = vmax.f32 %v513_v45, 0.0  ;;  %v600_v20 = vpop.permute.xlu0 %599 }
 0x1fa   :  { %v541_v52 = vmax.f32 %v505_v48, 0.0  ;;  %v730_v19 = vpop.permute.xlu1 %729 }
 0x1fb   :  { %v561_v53 = vpack.c.bf16 %v543_v50, %v542_v49  ;;  %897 = vmatpush3.bf16.msra.mxu0 %v559_v37  ;;  %925 = vmatpush3.bf16.msra.mxu1 %v559_v37 }
 0x1fc   :  { %v560_v58 = vpack.c.bf16 %v541_v52, %v540_v51  ;;  %v888_v59 = vpop.f32.mrb[12].mxu1 }
 0x1fd   :  { %v526_v60 = vadd.f32 %v888_v59, %v364_v54  ;;  %v517_v61 = vpop.f32.mrb[13].mxu1  ;;  %v605_v35 = vpop.permute.xlu0 %604 }
 0x1fe   :  { %v518_v63 = vadd.f32 %v517_v61, %v354_v42  ;;  %v889_v0 = vpop.f32.mrb[14].mxu1  ;;  %898 = vmatprep.subr.bf16.mxu0 %v560_v58  ;;  %918 = vmatprep.subr.bf16.mxu1 %v560_v58  ;;  %v735_v21 = vpop.permute.xlu1 %734 }
 0x1ff   :  { %v529_v1 = vadd.f32 %v889_v0, %v369_v62  ;;  %v520_v2 = vpop.f32.mrb[15].mxu1  ;;  %899 = vmatpush3.bf16.msra.mxu0 %v560_v58  ;;  %926 = vmatpush3.bf16.msra.mxu1 %v560_v58  ;;  %v546_v4 = vmax.f32 %v526_v60, 0.0 }
 0x200   :  { %v521_v3 = vadd.f32 %v520_v2, %v359_v47  ;;  %900 = vmatprep.subr.bf16.mxu0 %v561_v53  ;;  %919 = vmatprep.subr.bf16.mxu1 %v561_v53  ;;  %v544_v6 = vmax.f32 %v518_v63, 0.0 }
 0x201   :  { %v547_v5 = vmax.f32 %v529_v1, 0.0  ;;  %v610_v48 = vpop.permute.xlu0 %609 }
 0x202   :  { %v545_v7 = vmax.f32 %v521_v3, 0.0  ;;  %v740_v39 = vpop.permute.xlu1 %739 }
 0x203   :  { %v563_v8 = vpack.c.bf16 %v547_v5, %v546_v4  ;;  %901 = vmatpush3.bf16.msra.mxu0 %v561_v53  ;;  %927 = vmatpush3.bf16.msra.mxu1 %v561_v53 }
 0x204   :  { %v562_v9 = vpack.c.bf16 %v545_v7, %v544_v6 }
 0x205   :  { %v750_v63 = vpop.permute.xlu0 %749 }
 0x206   :  { %902 = vmatprep.subr.bf16.mxu0 %v562_v9  ;;  %920 = vmatprep.subr.bf16.mxu1 %v562_v9  ;;  %v745_v53 = vpop.permute.xlu1 %744 }
 0x207   :  { %903 = vmatpush3.bf16.msra.mxu0 %v562_v9  ;;  %928 = vmatpush3.bf16.msra.mxu1 %v562_v9  ;;  %v256_v9 = vmul.f32 0.5, %v255_v57 }
 0x208   :  { %904 = vmatprep.subr.bf16.mxu0 %v563_v8  ;;  %921 = vmatprep.subr.bf16.mxu1 %v563_v8 }
 0x20a   :  { %v755_v2 = vpop.permute.xlu1 %754 }
 0x20b   :  { %905 = vmatpush3.bf16.msra.mxu0 %v563_v8  ;;  %929 = vmatpush3.bf16.msra.mxu1 %v563_v8 }
 0x20e   :  { %907 = vmatmul.mubr.bf16.vlgmr.msra.gmra.mrb[8].mxu0 %v950_v10  ;;  %911 = vmatmul.mubr.bf16.vlgmr.msra.gmra.mrb[16].mxu1 %v951_v11  ;;  %v778_v11 = vld [vmem:[%s1254_s0] sm:$0x1] }
 0x2e1   :  { %v908_v22 = vpop.f32.mrb[8].mxu0  ;;  %v912_v23 = vpop.f32.mrb[16].mxu1 }
 0x2e2   :  { %v670_v24 = vpop.f32.mrb[9].mxu0  ;;  %v686_v25 = vpop.f32.mrb[17].mxu1  ;;  %v679_v26 = vadd.f32 %v908_v22, %v585_v14  ;;  %v695_v45 = vadd.f32 %v912_v23, %v605_v35  ;;  %v779_v14 = vadd.f32 %v778_v11, %v256_v9 }
 0x2e3   :  { %v671_v27 = vadd.f32 %v670_v24, %v575_v12  ;;  %v909_v28 = vpop.f32.mrb[10].mxu0  ;;  %v913_v29 = vpop.f32.mrb[18].mxu1  ;;  %v687_v37 = vadd.f32 %v686_v25, %v595_v18 }
 0x2e4   :  { %v673_v30 = vpop.f32.mrb[11].mxu0  ;;  %v689_v31 = vpop.f32.mrb[19].mxu1  ;;  %v682_v33 = vadd.f32 %v909_v28, %v590_v15  ;;  %v703_v36 = vmax.f32 %v679_v26, 0.0  ;;  %v698_v50 = vadd.f32 %v913_v29, %v610_v48  ;;  %v707_v54 = vmax.f32 %v695_v45, 0.0 }
 0x2e5   :  { %v701_v32 = vmax.f32 %v671_v27, 0.0  ;;  %v674_v34 = vadd.f32 %v673_v30, %v580_v13  ;;  %v690_v43 = vadd.f32 %v689_v31, %v600_v20  ;;  %v705_v46 = vmax.f32 %v687_v37, 0.0 }
 0x2e6   :  { %v704_v41 = vmax.f32 %v682_v33, 0.0  ;;  %v759_v44 = vmul.f32 %v730_v19, %v703_v36  ;;  %v708_v60 = vmax.f32 %v698_v50, 0.0  ;;  %v763_v0 = vmul.f32 %v750_v63, %v707_v54 }
 0x2e7   :  { %v702_v38 = vmax.f32 %v674_v34, 0.0  ;;  %v757_v40 = vmul.f32 %v720_v16, %v701_v32  ;;  %v706_v52 = vmax.f32 %v690_v43, 0.0  ;;  %v761_v58 = vmul.f32 %v740_v39, %v705_v46 }
 0x2e8   :  { %v760_v49 = vmul.f32 %v735_v21, %v704_v41  ;;  %v764_v3 = vmul.f32 %v755_v2, %v708_v60 }
 0x2e9   :  { %v758_v42 = vmul.f32 %v725_v17, %v702_v38  ;;  %v762_v61 = vmul.f32 %v745_v53, %v706_v52 }
 0x2eb   :  { %v765_v47 = vadd.f32 %v758_v42, %v757_v40 }
 0x2ed   :  { %v766_v51 = vadd.f32 %v765_v47, %v759_v44 }
 0x2ef   :  { %v767_v59 = vadd.f32 %v766_v51, %v760_v49 }
 0x2f1   :  { %v768_v62 = vadd.f32 %v767_v59, %v761_v58 }
 0x2f3   :  { %v769_v1 = vadd.f32 %v768_v62, %v762_v61 }
 0x2f5   :  { %v770_v4 = vadd.f32 %v769_v1, %v763_v0 }
 0x2f7   :  { %v771_v5 = vadd.f32 %v770_v4, %v764_v3 }
 0x2f9   :  { %v772_v6 = vrot.slane %v771_v5, 4 }
 0x2fb   :  { %v773_v7 = vadd.f32 %v772_v6, %v771_v5 }
 0x2fd   :  { %v774_v8 = vrot.slane %v773_v7, 2 }
 0x2ff   :  { %v775_v10 = vadd.f32 %v774_v8, %v773_v7 }
 0x301   :  { %v776_v12 = vrot.slane %v775_v10, 1 }
 0x303   :  { %v777_v13 = vadd.f32 %v776_v12, %v775_v10 }
 0x305   :  { %v780_v15 = vadd.f32 %v779_v14, %v777_v13 }
 0x307   :  { %781 = vst [vmem:[#allocation2] sm:$0x1] %v780_v15 }
 0x308   :  { %979 = shalt.err (!%p976_p4)
}
 0x309   :  { %s980_s0 = scalar_lea.hbm %s1263_s9, 16 }
 0x30a   :  { %p981_p5 = scmp.ne.s32.totalorder %s1263_s9, %s980_s0  ;;  %p984_p6 = scmp.lt.u32.totalorder %s980_s0, %s1263_s9 }
 0x30c   :  { %p986_p7 = pnand %p984_p6, %p981_p5 }
 0x30e   :  { %989 = shalt.err (!%p986_p7)
}
 0x30f   :  { %791 = dma.vmem_to_hbm [thread:$0]  %s789_s25, 16, %s1263_s9, [#allocation3]  }
 0x310   :  { %990 = dma.done.wait [#allocation3], 16  }
 0x311   :  { %991 = vsyncadd [#allocation3], 4294967280 }
 0x312   :  { %795 = vsyncpa [#allocation3], 1 }

</bundles_post_ra>
